<compile_context>
chip_gen: v7x
topology: tpu7x:2x2x1
jax: 0.10.0
libtpu: 0.0.40
codegen_flags: <defaults>
</compile_context>

<pallas_src>
import math

import jax
import jax.numpy as jnp
from jax.experimental import pallas as pl
from jax.experimental.pallas import tpu as pltpu

IN_DIM = 784
HID_DIM = 128
OUT_DIM = 10
OUT_PAD = 128   # lane-dense output width (do NOT shrink below 128 -> masked stores)


def _round_up(x, m):
    return ((x + m - 1) // m) * m


def mlp_kernel(x_ref, w1_ref, b1_ref, w2_ref, b2_ref, o_ref):
    # f32 -> bf16 cast happens here (VPU), so HBM only ever sees the original x.
    x = x_ref[...].astype(jnp.bfloat16)
    # Layer 1: (bt, 784)bf16 @ (784, 128)bf16 -> f32 accumulate, bias in f32.
    h = jnp.dot(x, w1_ref[...], preferred_element_type=jnp.float32)
    h = h + b1_ref[...]
    # Sigmoid in f32: exp on EUP, reciprocal on EUP (approx) instead of VPU divide.
    h = pl.reciprocal(1.0 + jnp.exp(-h), approx=True)
    # Layer 2: (bt, 128)bf16 @ (128, 128)bf16 -> f32 accumulate, bias in f32.
    out = jnp.dot(h.astype(w2_ref.dtype), w2_ref[...],
                  preferred_element_type=jnp.float32)
    o_ref[...] = (out + b2_ref[...]).astype(o_ref.dtype)


def simple_nn_forward(x, w1, b1, w2, b2, *, batch_tile=1024):
    """x: (B, 784) f32.  w1: (128, 784), b1: (128,), w2: (10, 128), b2: (10,)
    (PyTorch nn.Linear convention).  Returns (B, 10) f32."""
    B = x.shape[0]

    # Batch tile: multiple of 16 (bf16 sublane packing), capped at `batch_tile`.
    bt = min(batch_tile, _round_up(B, 16))
    grid_b = pl.cdiv(B, bt)  # partial last block is clipped by Pallas

    # --- One-time weight/bias layout prep (wrapper-side, tiny) ---
    w1_t = w1.T.astype(jnp.bfloat16)                             # (784, 128)
    b1_p = b1.reshape(1, HID_DIM).astype(jnp.float32)            # (1, 128)

    w2_t = jnp.zeros((HID_DIM, OUT_PAD), jnp.bfloat16)           # (128, 128)
    w2_t = w2_t.at[:, :OUT_DIM].set(w2.T.astype(jnp.bfloat16))

    b2_p = jnp.zeros((1, OUT_PAD), jnp.float32)
    b2_p = b2_p.at[0, :OUT_DIM].set(b2.astype(jnp.float32))

    # Advisory cost estimate (mem-bound kernel dominated by the f32 x stream).
    cost = pl.CostEstimate(
        flops=2 * B * (IN_DIM * HID_DIM + HID_DIM * OUT_PAD),
        transcendentals=B * HID_DIM,
        bytes_accessed=(B * IN_DIM * 4 + B * OUT_PAD * 2
                        + IN_DIM * HID_DIM * 2 + HID_DIM * OUT_PAD * 2
                        + HID_DIM * 4 + OUT_PAD * 4),
    )

    out_padded = pl.pallas_call(
        mlp_kernel,
        out_shape=jax.ShapeDtypeStruct((B, OUT_PAD), jnp.bfloat16),
        grid_spec=pltpu.PrefetchScalarGridSpec(
            num_scalar_prefetch=0,
            grid=(grid_b,),
            in_specs=[
                pl.BlockSpec((bt, IN_DIM), lambda i: (i, 0)),        # x tile (f32)
                pl.BlockSpec((IN_DIM, HID_DIM), lambda i: (0, 0)),   # w1 (resident)
                pl.BlockSpec((1, HID_DIM), lambda i: (0, 0)),        # b1
                pl.BlockSpec((HID_DIM, OUT_PAD), lambda i: (0, 0)),  # w2 (resident)
                pl.BlockSpec((1, OUT_PAD), lambda i: (0, 0)),        # b2
            ],
            out_specs=pl.BlockSpec((bt, OUT_PAD), lambda i: (i, 0)),
        ),
        compiler_params=pltpu.CompilerParams(
            dimension_semantics=("parallel",)),
        cost_estimate=cost,
    )(x, w1_t, b1_p, w2_t, b2_p)

    # Slice off the padded output columns; return f32 to match the PyTorch module.
    return out_padded[:, :OUT_DIM].astype(jnp.float32)


def xavier_uniform(key, out_features, in_features):
    # Matches torch.nn.init.xavier_uniform_ (gain=1.0) for a (out, in) weight.
    bound = math.sqrt(6.0 / (in_features + out_features))
    return jax.random.uniform(
        key, (out_features, in_features), dtype=jnp.float32,
        minval=-bound, maxval=bound)


if __name__ == "__main__":
    key = jax.random.PRNGKey(0)
    k_x, k_w1, k_w2 = jax.random.split(key, 3)

    B = 8
    x = jax.random.normal(k_x, (B, IN_DIM), dtype=jnp.float32)

    # Deterministic parameter init mirroring SimpleNN.init_weights()
    w1 = xavier_uniform(k_w1, HID_DIM, IN_DIM)       # (128, 784)
    b1 = jnp.zeros((HID_DIM,), dtype=jnp.float32)    # constant 0.0
    w2 = xavier_uniform(k_w2, OUT_DIM, HID_DIM)      # (10, 128)
    b2 = jnp.zeros((OUT_DIM,), dtype=jnp.float32)    # constant 0.0

    out = simple_nn_forward(x, w1, b1, w2, b2)
    out = jax.block_until_ready(out)

    # Sanity check vs pure-JAX f32 reference (bf16 matmul inputs + approx
    # reciprocal -> relaxed tolerance).
    ref = jax.nn.sigmoid(x @ w1.T + b1) @ w2.T + b2
    assert out.shape == (B, OUT_DIM)
    assert jnp.allclose(out, ref, atol=2e-2, rtol=2e-2)

    print("KERNEL_OK")
</pallas_src>

<mosaic_0001>
module attributes {stable_mosaic.version = 11 : i64} {
  func.func @mlp_kernel(%arg0: i32, %arg1: memref<16x784xf32, #tpu.memory_space<vmem>>, %arg2: memref<784x128xbf16, #tpu.memory_space<vmem>>, %arg3: memref<1x128xf32, #tpu.memory_space<vmem>>, %arg4: memref<128x128xbf16, #tpu.memory_space<vmem>>, %arg5: memref<1x128xf32, #tpu.memory_space<vmem>>, %arg6: memref<16x128xbf16, #tpu.memory_space<vmem>>) attributes {dimension_semantics = [#tpu.dimension_semantics<parallel>], iteration_bounds = array<i64: 1>, scalar_prefetch = 0 : i64, scratch_operands = 0 : i64, tpu.core_type = #tpu.core_type<tc>, window_params = [{transform_indices = @transform_0, window_bounds = array<i64: 16, 784>}, {pipeline_mode = #tpu.pipeline_mode<synchronous>, transform_indices = @transform_1, window_bounds = array<i64: 784, 128>}, {pipeline_mode = #tpu.pipeline_mode<synchronous>, transform_indices = @transform_2, window_bounds = array<i64: 1, 128>}, {pipeline_mode = #tpu.pipeline_mode<synchronous>, transform_indices = @transform_3, window_bounds = array<i64: 128, 128>}, {pipeline_mode = #tpu.pipeline_mode<synchronous>, transform_indices = @transform_4, window_bounds = array<i64: 1, 128>}, {transform_indices = @transform_5, window_bounds = array<i64: 16, 128>}]} {
    %c0 = arith.constant 0 : index
    %c0_0 = arith.constant 0 : index
    %0 = vector.load %arg1[%c0, %c0_0] : memref<16x784xf32, #tpu.memory_space<vmem>>, vector<16x784xf32>
    %1 = arith.truncf %0 : vector<16x784xf32> to vector<16x784xbf16>
    %c0_1 = arith.constant 0 : index
    %c0_2 = arith.constant 0 : index
    %2 = vector.load %arg2[%c0_1, %c0_2] : memref<784x128xbf16, #tpu.memory_space<vmem>>, vector<784x128xbf16>
    %cst = arith.constant dense<0.000000e+00> : vector<16x128xf32>
    %3 = tpu.matmul %1, %2, %cst {dimension_numbers = #tpu.dot_dimension_numbers<[1], [0], [0], [1], [0, 0, 1, 1], [], []>} : vector<16x784xbf16>, vector<784x128xbf16>, vector<16x128xf32> -> vector<16x128xf32>
    %c0_3 = arith.constant 0 : index
    %c0_4 = arith.constant 0 : index
    %4 = vector.load %arg3[%c0_3, %c0_4] : memref<1x128xf32, #tpu.memory_space<vmem>>, vector<1x128xf32>
    %5 = vector.broadcast %4 : vector<1x128xf32> to vector<16x128xf32>
    %6 = arith.addf %3, %5 : vector<16x128xf32>
    %cst_5 = arith.constant 0.000000e+00 : f32
    %7 = vector.broadcast %cst_5 : f32 to vector<16x128xf32>
    %8 = arith.subf %7, %6 : vector<16x128xf32>
    %9 = math.exp %8 : vector<16x128xf32>
    %cst_6 = arith.constant 1.000000e+00 : f32
    %10 = vector.broadcast %cst_6 : f32 to vector<16x128xf32>
    %11 = arith.addf %10, %9 : vector<16x128xf32>
    %12 = tpu.reciprocal %11 {approx = true} : vector<16x128xf32> -> vector<16x128xf32>
    %13 = arith.truncf %12 : vector<16x128xf32> to vector<16x128xbf16>
    %c0_7 = arith.constant 0 : index
    %c0_8 = arith.constant 0 : index
    %14 = vector.load %arg4[%c0_7, %c0_8] : memref<128x128xbf16, #tpu.memory_space<vmem>>, vector<128x128xbf16>
    %cst_9 = arith.constant dense<0.000000e+00> : vector<16x128xf32>
    %15 = tpu.matmul %13, %14, %cst_9 {dimension_numbers = #tpu.dot_dimension_numbers<[1], [0], [0], [1], [0, 0, 1, 1], [], []>} : vector<16x128xbf16>, vector<128x128xbf16>, vector<16x128xf32> -> vector<16x128xf32>
    %c0_10 = arith.constant 0 : index
    %c0_11 = arith.constant 0 : index
    %16 = vector.load %arg5[%c0_10, %c0_11] : memref<1x128xf32, #tpu.memory_space<vmem>>, vector<1x128xf32>
    %17 = vector.broadcast %16 : vector<1x128xf32> to vector<16x128xf32>
    %18 = arith.addf %15, %17 : vector<16x128xf32>
    %19 = arith.truncf %18 : vector<16x128xf32> to vector<16x128xbf16>
    %c0_12 = arith.constant 0 : index
    %c0_13 = arith.constant 0 : index
    %20 = vector.load %arg6[%c0_12, %c0_13] : memref<16x128xbf16, #tpu.memory_space<vmem>>, vector<16x128xbf16>
    tpu.vector_store %arg6[%c0_12, %c0_13], %19 {strides = array<i32>} : memref<16x128xbf16, #tpu.memory_space<vmem>>, vector<16x128xbf16>,
    return
  }
  func.func @transform_0(%arg0: i32) -> (i32, i32) {
    %c0_i32 = arith.constant 0 : i32
    %c0_i32_0 = arith.constant 0 : i32
    return %arg0, %c0_i32 : i32, i32
  }
  func.func @transform_1(%arg0: i32) -> (i32, i32) {
    %c0_i32 = arith.constant 0 : i32
    %c0_i32_0 = arith.constant 0 : i32
    %c0_i32_1 = arith.constant 0 : i32
    return %c0_i32, %c0_i32_0 : i32, i32
  }
  func.func @transform_2(%arg0: i32) -> (i32, i32) {
    %c0_i32 = arith.constant 0 : i32
    %c0_i32_0 = arith.constant 0 : i32
    %c0_i32_1 = arith.constant 0 : i32
    return %c0_i32, %c0_i32_0 : i32, i32
  }
  func.func @transform_3(%arg0: i32) -> (i32, i32) {
    %c0_i32 = arith.constant 0 : i32
    %c0_i32_0 = arith.constant 0 : i32
    %c0_i32_1 = arith.constant 0 : i32
    return %c0_i32, %c0_i32_0 : i32, i32
  }
  func.func @transform_4(%arg0: i32) -> (i32, i32) {
    %c0_i32 = arith.constant 0 : i32
    %c0_i32_0 = arith.constant 0 : i32
    %c0_i32_1 = arith.constant 0 : i32
    return %c0_i32, %c0_i32_0 : i32, i32
  }
  func.func @transform_5(%arg0: i32) -> (i32, i32) {
    %c0_i32 = arith.constant 0 : i32
    %c0_i32_0 = arith.constant 0 : i32
    return %arg0, %c0_i32 : i32, i32
  }
}

</mosaic_0001>

<bundles_post_ra>
// kernel: tpu_custom_call.1
= control target key start
LH: loop header
LB: loop body
LE: loop exit
PB: predicated region body
PF: predicated region fallthrough
CT: control target
= control target key end

     0   :  { %10 = vsyncpa [#allocation3], 0  ;;  %s1259_s0 = inlined_call_operand.hbm [shape: f32[8,784], index: 0, kind: input, shape index: {}]   ;;  %s1260_s1 = inlined_call_operand.hbm [shape: bf16[784,128], index: 1, kind: input, shape index: {}]   ;;  %s1261_s2 = inlined_call_operand.vmem [shape: f32[1,128], index: 2, kind: input, shape index: {}]   ;;  %s1262_s3 = inlined_call_operand.hbm [shape: bf16[128,128], index: 3, kind: input, shape index: {}]   ;;  %s1263_s4 = inlined_call_operand.vmem [shape: f32[1,128], index: 4, kind: input, shape index: {}]   ;;  %s1264_s5 = inlined_call_operand.hbm [shape: bf16[8,128], index: 5, kind: output, shape index: {}]  }
   0x1   :  { %11 = vsyncpa [#allocation6], 0 }
   0x2   :  { %12 = vsyncpa [#allocation4], 0 }
   0x3   :  { %17 = vsyncadd [#allocation3], 896  ;;  %s1143_s18 = smov [#allocation5]   ;;  %s1049_s22 = scalar_lea.hbm %s1260_s1, 6272 }
   0x4   :  { %s30_s19 = sshll.u32 %s1143_s18, 4  ;;  %p1050_p0 = scmp.ne.s32.totalorder %s1260_s1, %s1049_s22  ;;  %s31_s19 = int_to_ptr.vmem [resolvable:$true] %s30_s19 }
   0x5   :  { %p1053_p1 = scmp.lt.u32.totalorder %s1049_s22, %s1260_s1 }
   0x7   :  { %p1055_p2 = pnand %p1053_p1, %p1050_p0 }
   0x9   :  { %1058 = shalt.err (!%p1055_p2)
}
   0xa   :  { %s1059_s27 = scalar_lea.vmem %s31_s19, 6272  ;;  %p1064_p4 = scmp.lt.s32.totalorder %s31_s19, %s31_s19 }
   0xb   :  { %p1060_p3 = scmp.ne.s32.totalorder %s31_s19, %s1059_s27  ;;  %p1065_p5 = scmp.lt.s32.totalorder %s1059_s27, %s1059_s27 }
   0xd   :  { %p1066_p6 = por %p1065_p5, %p1064_p4 }
   0xf   :  { %p1067_p7 = pnand %p1066_p6, %p1060_p3 }
  0x11   :  { %1070 = shalt.err (!%p1067_p7)
}
  0x12   :  { %s1144_s28 = smov 64   ;;  %s1145_s29 = smov 4  }
  0x13   :  { %36 = dma.hbm_to_vmem [thread:$0]  %s1260_s1, 6272, %s31_s19, [#allocation6], %s1144_s28, %s1144_s28, %s1145_s29  }
  0x14   :  { %s1146_s7 = smov [#allocation2]   ;;  %s1071_s11 = scalar_lea.hbm %s1259_s0, 896 }
  0x15   :  { %s18_s8 = sshll.u32 %s1146_s7, 4  ;;  %p1072_p8 = scmp.ne.s32.totalorder %s1259_s0, %s1071_s11  ;;  %s19_s8 = int_to_ptr.vmem [resolvable:$true] %s18_s8 }
  0x16   :  { %p1075_p9 = scmp.lt.u32.totalorder %s1071_s11, %s1259_s0 }
  0x18   :  { %p1077_p10 = pnand %p1075_p9, %p1072_p8 }
  0x1a   :  { %1080 = shalt.err (!%p1077_p10)
}
  0x1b   :  { %s1081_s16 = scalar_lea.vmem %s19_s8, 896  ;;  %s1085_s1 = scalar_lea.vmem %s19_s8, 1792 }
  0x1c   :  { %p1082_p11 = scmp.ne.s32.totalorder %s19_s8, %s1081_s16  ;;  %p1086_p12 = scmp.lt.s32.totalorder %s19_s8, %s19_s8 }
  0x1d   :  { %p1087_p13 = scmp.lt.s32.totalorder %s1085_s1, %s1081_s16 }
  0x1f   :  { %p1088_p0 = por %p1087_p13, %p1086_p12 }
  0x21   :  { %p1089_p1 = pnand %p1088_p0, %p1082_p11 }
  0x23   :  { %1092 = shalt.err (!%p1089_p1)
}
  0x24   :  { %s1147_s17 = smov 896   ;;  %s1148_s18 = smov 56  }
  0x25   :  { %24 = dma.hbm_to_vmem [thread:$0]  %s1259_s0, 896, %s19_s8, [#allocation3], %s1147_s17, %s1147_s17, %s1148_s18  }
  0x26   :  { %s1149_s21 = smov [#allocation7]   ;;  %s1093_s25 = scalar_lea.hbm %s1262_s3, 1024 }
  0x27   :  { %s44_s22 = sshll.u32 %s1149_s21, 4  ;;  %p1094_p2 = scmp.ne.s32.totalorder %s1262_s3, %s1093_s25  ;;  %s45_s22 = int_to_ptr.vmem [resolvable:$true] %s44_s22 }
  0x28   :  { %p1097_p3 = scmp.lt.u32.totalorder %s1093_s25, %s1262_s3 }
  0x2a   :  { %p1099_p4 = pnand %p1097_p3, %p1094_p2 }
  0x2c   :  { %1102 = shalt.err (!%p1099_p4)
}
  0x2d   :  { %s1103_s7 = scalar_lea.vmem %s45_s22, 1024  ;;  %p1108_p6 = scmp.lt.s32.totalorder %s45_s22, %s45_s22 }
  0x2e   :  { %p1104_p5 = scmp.ne.s32.totalorder %s45_s22, %s1103_s7  ;;  %p1109_p7 = scmp.lt.s32.totalorder %s1103_s7, %s1103_s7 }
  0x30   :  { %p1110_p8 = por %p1109_p7, %p1108_p6 }
  0x32   :  { %p1111_p9 = pnand %p1110_p8, %p1104_p5 }
  0x34   :  { %1114 = shalt.err (!%p1111_p9)
}
  0x35   :  { %50 = dma.hbm_to_vmem [thread:$0]  %s1262_s3, 1024, %s45_s22, [#allocation6], %s1144_s28, %s1144_s28, %s1145_s29  }
  0x36   :  { %1137 = dma.done.wait [#allocation3], 1792  }
  0x37   :  { %1138 = vsyncadd [#allocation3], 4294965504 }
  0x38   :  { %1139 = dma.done.wait [#allocation6], 7296  }
  0x39   :  { %1140 = vsyncadd [#allocation6], 4294960000  ;;  %v984_v0 = vld [vmem:[#allocation5 + $0x40] sm:$0xff]   ;;  %v988_v4 = vld [vmem:[#allocation5 + $0x48] sm:$0xff]   ;;  %v1150_v43 = vmov 0.0   ;;  %vm1151_vm0 = vmmov 0  }
  0x3a   :  { %v985_v1 = vld [vmem:[#allocation5] sm:$0xff]   ;;  %871 = vmatprep.subr.bf16.mxu0 %v984_v0  ;;  %v989_v5 = vld [vmem:[#allocation5 + $0x8] sm:$0xff]   ;;  %v992_v8 = vld [vmem:[#allocation5 + $0x50] sm:$0xff]   ;;  %vm483_vm1 = vcmask 130048  }
  0x3b   :  { %v986_v2 = vld [vmem:[#allocation5 + $0xc0] sm:$0xff]   ;;  %872 = vmatpush3.bf16.msra.mxu0 %v985_v1  ;;  %v990_v6 = vld [vmem:[#allocation5 + $0xc8] sm:$0xff]   ;;  %v993_v9 = vld [vmem:[#allocation5 + $0x10] sm:$0xff]  }
  0x3c   :  { %v987_v3 = vld [vmem:[#allocation5 + $0x80] sm:$0xff]   ;;  %893 = vmatprep.subr.bf16.mxu1 %v986_v2  ;;  %873 = vmatprep.subr.bf16.mxu0 %v988_v4  ;;  %v991_v7 = vld [vmem:[#allocation5 + $0x88] sm:$0xff]   ;;  %v994_v10 = vld [vmem:[#allocation5 + $0xd0] sm:$0xff]  }
  0x3d   :  { %894 = vmatpush3.bf16.msra.mxu1 %v987_v3  ;;  %v995_v11 = vld [vmem:[#allocation5 + $0x90] sm:$0xff]   ;;  %v996_v12 = vld [vmem:[#allocation5 + $0x58] sm:$0xff]   ;;  %v1000_v16 = vld [vmem:[#allocation5 + $0x60] sm:$0xff]  }
  0x3e   :  { %895 = vmatprep.subr.bf16.mxu1 %v990_v6  ;;  %v997_v13 = vld [vmem:[#allocation5 + $0x18] sm:$0xff]   ;;  %v1001_v17 = vld [vmem:[#allocation5 + $0x20] sm:$0xff]   ;;  %v1004_v20 = vld [vmem:[#allocation5 + $0x68] sm:$0xff]  }
  0x3f   :  { %874 = vmatpush3.bf16.msra.mxu0 %v989_v5  ;;  %v998_v14 = vld [vmem:[#allocation5 + $0xd8] sm:$0xff]   ;;  %v1002_v18 = vld [vmem:[#allocation5 + $0xe0] sm:$0xff]   ;;  %v1005_v21 = vld [vmem:[#allocation5 + $0x28] sm:$0xff]  }
  0x40   :  { %875 = vmatprep.subr.bf16.mxu0 %v992_v8  ;;  %v999_v15 = vld [vmem:[#allocation5 + $0x98] sm:$0xff]   ;;  %v1003_v19 = vld [vmem:[#allocation5 + $0xa0] sm:$0xff]   ;;  %v1006_v22 = vld [vmem:[#allocation5 + $0xe8] sm:$0xff]  }
  0x41   :  { %896 = vmatpush3.bf16.msra.mxu1 %v991_v7  ;;  %v1007_v23 = vld [vmem:[#allocation5 + $0xa8] sm:$0xff]   ;;  %v1008_v24 = vld [vmem:[#allocation5 + $0x70] sm:$0xff]   ;;  %v1012_v28 = vld [vmem:[#allocation5 + $0x78] sm:$0xff]  }
  0x42   :  { %897 = vmatprep.subr.bf16.mxu1 %v994_v10  ;;  %v1009_v25 = vld [vmem:[#allocation5 + $0x30] sm:$0xff]   ;;  %v1013_v29 = vld [vmem:[#allocation5 + $0x38] sm:$0xff]   ;;  %v70_v36 = vld [vmem:[#allocation2 + $0x38] sm:$0xff] }
  0x43   :  { %876 = vmatpush3.bf16.msra.mxu0 %v993_v9  ;;  %v1010_v26 = vld [vmem:[#allocation5 + $0xf0] sm:$0xff]   ;;  %v1014_v30 = vld [vmem:[#allocation5 + $0xf8] sm:$0xff]   ;;  %v1016_v38 = vld [vmem:[#allocation5 + $0x140] sm:$0xff]  }
  0x44   :  { %877 = vmatprep.subr.bf16.mxu0 %v996_v12  ;;  %v1011_v27 = vld [vmem:[#allocation5 + $0xb0] sm:$0xff]   ;;  %v64_v31 = vld [vmem:[#allocation2 + $0x8] sm:$0xff]  ;;  %v66_v39 = vld [vmem:[#allocation2 + $0x18] sm:$0xff] }
  0x45   :  { %898 = vmatpush3.bf16.msra.mxu1 %v995_v11  ;;  %v71_v32 = vld [vmem:[#allocation2 + $0x40] sm:$0xff]  ;;  %v1015_v34 = vld [vmem:[#allocation5 + $0xb8] sm:$0xff]   ;;  %v73_v40 = vld [vmem:[#allocation2 + $0x50] sm:$0xff] }
  0x46   :  { %899 = vmatprep.subr.bf16.mxu1 %v998_v14  ;;  %v78_v33 = vpack.c.bf16 %v71_v32, %v64_v31  ;;  %v63_v35 = vld [vmem:[#allocation2] sm:$0xff]  ;;  %v80_v41 = vpack.c.bf16 %v73_v40, %v66_v39  ;;  %v1017_v42 = vld [vmem:[#allocation5 + $0x100] sm:$0xff]   ;;  %v72_v45 = vld [vmem:[#allocation2 + $0x48] sm:$0xff] }
  0x47   :  { %878 = vmatpush3.bf16.msra.mxu0 %v997_v13  ;;  %v77_v37 = vpack.c.bf16 %v70_v36, %v63_v35  ;;  %v65_v44 = vld [vmem:[#allocation2 + $0x10] sm:$0xff]  ;;  %v1018_v47 = vld [vmem:[#allocation5 + $0x148] sm:$0xff]   ;;  %v1020_v49 = vld [vmem:[#allocation5 + $0x150] sm:$0xff]  }
  0x48   :  { %879 = vmatprep.subr.bf16.mxu0 %v1000_v16  ;;  %519 = vmatprep.mubr.bf16.mxu0 %v78_v33  ;;  %v79_v46 = vpack.c.bf16 %v72_v45, %v65_v44  ;;  %v1019_v48 = vld [vmem:[#allocation5 + $0x108] sm:$0xff]   ;;  %v1021_v50 = vld [vmem:[#allocation5 + $0x110] sm:$0xff]   ;;  %v1022_v51 = vld [vmem:[#allocation5 + $0x158] sm:$0xff]  }
  0x49   :  { %900 = vmatpush3.bf16.msra.mxu1 %v999_v15  ;;  %560 = vmatprep.mubr.bf16.mxu1 %v80_v41  ;;  %v1023_v52 = vld [vmem:[#allocation5 + $0x118] sm:$0xff]   ;;  %v1024_v53 = vld [vmem:[#allocation5 + $0x160] sm:$0xff]   ;;  %v1026_v55 = vld [vmem:[#allocation5 + $0x168] sm:$0xff]  }
  0x4a   :  { %901 = vmatprep.subr.bf16.mxu1 %v1002_v18  ;;  %v1025_v54 = vld [vmem:[#allocation5 + $0x120] sm:$0xff]   ;;  %v68_v57 = vld [vmem:[#allocation2 + $0x28] sm:$0xff]  ;;  %v1027_v58 = vld [vmem:[#allocation5 + $0x128] sm:$0xff]  }
  0x4b   :  { %880 = vmatpush3.bf16.msra.mxu0 %v1001_v17  ;;  %v1032_v56 = vld [vmem:[#allocation5 + $0x180] sm:$0xff]   ;;  %v1028_v59 = vld [vmem:[#allocation5 + $0x170] sm:$0xff]   ;;  %v76_v63 = vld [vmem:[#allocation2 + $0x68] sm:$0xff] }
  0x4c   :  { %881 = vmatprep.subr.bf16.mxu0 %v1004_v20  ;;  %v75_v60 = vld [vmem:[#allocation2 + $0x60] sm:$0xff]  ;;  %v69_v62 = vld [vmem:[#allocation2 + $0x30] sm:$0xff]  ;;  %v1030_v2 = vld [vmem:[#allocation5 + $0x178] sm:$0xff]  }
  0x4d   :  { %902 = vmatpush3.bf16.msra.mxu1 %v1003_v19  ;;  %v82_v61 = vpack.c.bf16 %v75_v60, %v68_v57  ;;  %v83_v0 = vpack.c.bf16 %v76_v63, %v69_v62  ;;  %v1029_v1 = vld [vmem:[#allocation5 + $0x130] sm:$0xff]   ;;  %v1031_v3 = vld [vmem:[#allocation5 + $0x138] sm:$0xff]   ;;  %v74_v5 = vld [vmem:[#allocation2 + $0x58] sm:$0xff] }
  0x4e   :  { %903 = vmatprep.subr.bf16.mxu1 %v1006_v22  ;;  %v67_v4 = vld [vmem:[#allocation2 + $0x20] sm:$0xff]  ;;  %v1033_v7 = vld [vmem:[#allocation7] sm:$0xff]   ;;  %v1035_v9 = vld [vmem:[#allocation7 + $0x10] sm:$0xff]  }
  0x4f   :  { %882 = vmatpush3.bf16.msra.mxu0 %v1005_v21  ;;  %v81_v6 = vpack.c.bf16 %v74_v5, %v67_v4  ;;  %v1034_v8 = vld [vmem:[#allocation7 + $0x8] sm:$0xff]   ;;  %v1036_v10 = vld [vmem:[#allocation7 + $0x18] sm:$0xff]   ;;  %v1037_v11 = vld [vmem:[#allocation7 + $0x20] sm:$0xff]  }
  0x50   :  { %883 = vmatprep.subr.bf16.mxu0 %v1008_v24  ;;  %v1038_v12 = vld [vmem:[#allocation7 + $0x28] sm:$0xff]   ;;  %v1039_v13 = vld [vmem:[#allocation7 + $0x30] sm:$0xff]   ;;  %v1040_v14 = vld [vmem:[#allocation7 + $0x38] sm:$0xff]  }
  0x51   :  { %904 = vmatpush3.bf16.msra.mxu1 %v1007_v23  ;;  %v802_v16 = vld [vmem:[%s1261_s2] ss:$0 sm:$0xff] }
  0x52   :  { %905 = vmatprep.subr.bf16.mxu1 %v1010_v26  ;;  %v853_v57 = vld [vmem:[%s1263_s4] ss:$0 sm:$0xff] }
  0x53   :  { %884 = vmatpush3.bf16.msra.mxu0 %v1009_v25 }
  0x54   :  { %885 = vmatprep.subr.bf16.mxu0 %v1012_v28 }
  0x55   :  { %906 = vmatpush3.bf16.msra.mxu1 %v1011_v27 }
  0x56   :  { %907 = vmatprep.subr.bf16.mxu1 %v1014_v30 }
  0x57   :  { %886 = vmatpush3.bf16.msra.mxu0 %v1013_v29 }
  0x58   :  { %915 = vmatprep.subr.bf16.mxu0 %v1016_v38 }
  0x59   :  { %908 = vmatpush3.bf16.msra.mxu1 %v1015_v34 }
  0x5a   :  { %948 = vmatprep.subr.bf16.mxu1 %v1150_v43  ;;  %520 = vmatmul.mubr.bf16.vlgmr.msra.gmra.mrb[0].mxu0 %v77_v37 }
  0x5b   :  { %916 = vmatpush3.bf16.msra.mxu0 %v1017_v42  ;;  %601 = vmatprep.mubr.bf16.mxu0 %v82_v61 }
  0x5c   :  { %561 = vmatmul.mubr.bf16.vlgmr.msra.gmra.mrb[0].mxu1 %v79_v46  ;;  %917 = vmatprep.subr.bf16.mxu0 %v1018_v47 }
  0x5d   :  { %950 = vmatprep.mubr.msk.bf16.mxu1 %vm1151_vm0, %v1150_v43  ;;  %949 = vmatpush3.bf16.msra.mxu1 %v1032_v56 }
  0x5e   :  { %954 = vmatprep.subr.bf16.mxu1 %v1150_v43 }
  0x5f   :  { %918 = vmatpush3.bf16.msra.mxu0 %v1019_v48 }
  0x60   :  { %919 = vmatprep.subr.bf16.mxu0 %v1020_v49 }
  0x63   :  { %920 = vmatpush3.bf16.msra.mxu0 %v1021_v50 }
  0x64   :  { %921 = vmatprep.subr.bf16.mxu0 %v1022_v51  ;;  %951 = vmatmul.mubr.msk.bf16.vlgmr.msra.gmra.mrb[4].mxu1 %vm483_vm1, %v83_v0 }
  0x65   :  { %970 = vmatprep.mubr.msk.bf16.mxu1 %vm1151_vm0, %v1150_v43  ;;  %955 = vmatpush3.bf16.msra.mxu1 %v1033_v7 }
  0x66   :  { %956 = vmatprep.subr.bf16.mxu1 %v1150_v43 }
  0x67   :  { %922 = vmatpush3.bf16.msra.mxu0 %v1023_v52 }
  0x68   :  { %923 = vmatprep.subr.bf16.mxu0 %v1024_v53 }
  0x69   :  { %957 = vmatpush3.bf16.msra.mxu1 %v1034_v8 }
  0x6a   :  { %958 = vmatprep.subr.bf16.mxu1 %v1150_v43 }
  0x6b   :  { %924 = vmatpush3.bf16.msra.mxu0 %v1025_v54 }
  0x6c   :  { %925 = vmatprep.subr.bf16.mxu0 %v1026_v55 }
  0x6d   :  { %959 = vmatpush3.bf16.msra.mxu1 %v1035_v9 }
  0x6e   :  { %960 = vmatprep.subr.bf16.mxu1 %v1150_v43 }
  0x6f   :  { %926 = vmatpush3.bf16.msra.mxu0 %v1027_v58 }
  0x70   :  { %927 = vmatprep.subr.bf16.mxu0 %v1028_v59 }
  0x71   :  { %961 = vmatpush3.bf16.msra.mxu1 %v1036_v10 }
  0x72   :  { %962 = vmatprep.subr.bf16.mxu1 %v1150_v43 }
  0x73   :  { %928 = vmatpush3.bf16.msra.mxu0 %v1029_v1 }
  0x74   :  { %929 = vmatprep.subr.bf16.mxu0 %v1030_v2 }
  0x75   :  { %963 = vmatpush3.bf16.msra.mxu1 %v1037_v11 }
  0x76   :  { %964 = vmatprep.subr.bf16.mxu1 %v1150_v43 }
  0x77   :  { %930 = vmatpush3.bf16.msra.mxu0 %v1031_v3 }
  0x79   :  { %965 = vmatpush3.bf16.msra.mxu1 %v1038_v12 }
  0x7a   :  { %602 = vmatmul.mubr.bf16.vlgmr.msra.gmra.mrb[4].mxu0 %v81_v6  ;;  %966 = vmatprep.subr.bf16.mxu1 %v1150_v43 }
  0x7d   :  { %967 = vmatpush3.bf16.msra.mxu1 %v1039_v13 }
  0x7e   :  { %968 = vmatprep.subr.bf16.mxu1 %v1150_v43 }
  0x81   :  { %969 = vmatpush3.bf16.msra.mxu1 %v1040_v14 }
 0x12d   :  { %v887_v15 = vpop.f32.mrb[0].mxu0 }
 0x12e   :  { %v888_v17 = vpop.f32.mrb[1].mxu0 }
 0x12f   :  { %v889_v18 = vadd.f32 %v888_v17, %v887_v15  ;;  %v890_v19 = vpop.f32.mrb[2].mxu0  ;;  %v909_v20 = vpop.f32.mrb[0].mxu1 }
 0x130   :  { %v891_v21 = vpop.f32.mrb[3].mxu0  ;;  %v910_v24 = vpop.f32.mrb[1].mxu1 }
 0x131   :  { %v522_v22 = vadd.f32 %v889_v18, %v802_v16  ;;  %v892_v23 = vadd.f32 %v891_v21, %v890_v19  ;;  %v911_v25 = vadd.f32 %v910_v24, %v909_v20  ;;  %v912_v26 = vpop.f32.mrb[2].mxu1 }
 0x132   :  { %v913_v28 = vpop.f32.mrb[3].mxu1 }
 0x133   :  { %v525_v27 = vadd.f32 %v892_v23, %v802_v16  ;;  %v563_v29 = vadd.f32 %v911_v25, %v522_v22  ;;  %v914_v30 = vadd.f32 %v913_v28, %v912_v26 }
 0x135   :  { %v566_v31 = vadd.f32 %v914_v30, %v525_v27 }
 0x137   :  { %v644_v32 = vpop.f32.mrb[4].mxu1 }
 0x138   :  { %v952_v33 = vpop.f32.mrb[5].mxu1 }
 0x139   :  { %v647_v34 = vpop.f32.mrb[6].mxu1 }
 0x13a   :  { %v953_v35 = vpop.f32.mrb[7].mxu1 }
 0x14d   :  { %v931_v36 = vpop.f32.mrb[4].mxu0 }
 0x14e   :  { %v932_v37 = vpop.f32.mrb[5].mxu0 }
 0x14f   :  { %v933_v38 = vadd.f32 %v932_v37, %v931_v36  ;;  %v934_v39 = vpop.f32.mrb[6].mxu0 }
 0x150   :  { %v935_v40 = vpop.f32.mrb[7].mxu0 }
 0x151   :  { %v604_v41 = vadd.f32 %v933_v38, %v563_v29  ;;  %v936_v42 = vadd.f32 %v935_v40, %v934_v39 }
 0x153   :  { %v645_v43 = vadd.f32 %v644_v32, %v604_v41  ;;  %v607_v44 = vadd.f32 %v936_v42, %v566_v31 }
 0x155   :  { %v651_v45 = vsub.f32 0.0, %v645_v43  ;;  %v648_v46 = vadd.f32 %v647_v34, %v607_v44 }
 0x157   :  { %v653_v47 = vmul.f32 1.442695, %v651_v45  ;;  %v652_v48 = vsub.f32 0.0, %v648_v46 }
 0x159   :  { %1041 = vpow2.f32 %v653_v47  ;;  %v655_v49 = vmul.f32 1.442695, %v652_v48 }
 0x15b   :  { %1043 = vpow2.f32 %v655_v49 }
 0x163   :  { %v1042_v50 = vpop.eup %1041 }
 0x164   :  { %v657_v51 = vadd.f32 1.0, %v1042_v50 }
 0x165   :  { %v1044_v52 = vpop.eup %1043 }
 0x166   :  { %v658_v53 = vadd.f32 1.0, %v1044_v52  ;;  %1045 = vrcp.f32 %v657_v51 }
 0x168   :  { %1047 = vrcp.f32 %v658_v53 }
 0x170   :  { %v1046_v54 = vpop.eup %1045 }
 0x172   :  { %v1048_v55 = vpop.eup %1047 }
 0x173   :  { %v661_v56 = vpack.c.bf16 %v1048_v55, %v1046_v54 }
 0x175   :  { %971 = vmatmul.mubr.bf16.vlgmr.msra.gmra.mrb[8].mxu1 %v661_v56 }
 0x248   :  { %v767_v58 = vpop.f32.mrb[8].mxu1 }
 0x249   :  { %v972_v59 = vpop.f32.mrb[9].mxu1  ;;  %v768_v61 = vadd.f32 %v853_v57, %v767_v58 }
 0x24a   :  { %v770_v60 = vpop.f32.mrb[10].mxu1 }
 0x24b   :  { %v771_v62 = vadd.f32 %v853_v57, %v770_v60  ;;  %v973_v63 = vpop.f32.mrb[11].mxu1 }
 0x24d   :  { %v869_v0 = vpack.c.bf16 %v771_v62, %v768_v61 }
 0x24f   :  { %870 = vst [vmem:[#allocation8] sm:$0xff] %v869_v0  }
 0x250   :  { %788 = vsyncadd [#allocation4], 64  ;;  %s1152_s11 = smov [#allocation8]  }
 0x251   :  { %s789_s12 = sshll.u32 %s1152_s11, 4  ;;  %s790_s12 = int_to_ptr.vmem [resolvable:$true] %s789_s12 }
 0x252   :  { %s1115_s13 = scalar_lea.vmem %s790_s12, 64  ;;  %s1119_s14 = scalar_lea.vmem %s790_s12, 128 }
 0x253   :  { %p1116_p10 = scmp.ne.s32.totalorder %s790_s12, %s1115_s13  ;;  %p1120_p11 = scmp.lt.s32.totalorder %s790_s12, %s790_s12 }
 0x254   :  { %p1121_p12 = scmp.lt.s32.totalorder %s1119_s14, %s1115_s13 }
 0x256   :  { %p1122_p13 = por %p1121_p12, %p1120_p11 }
 0x258   :  { %p1123_p0 = pnand %p1122_p13, %p1116_p10 }
 0x25a   :  { %1126 = shalt.err (!%p1123_p0)
}
 0x25b   :  { %s1127_s16 = scalar_lea.hbm %s1264_s5, 64 }
 0x25c   :  { %p1128_p1 = scmp.ne.s32.totalorder %s1264_s5, %s1127_s16  ;;  %p1131_p2 = scmp.lt.u32.totalorder %s1127_s16, %s1264_s5 }
 0x25e   :  { %p1133_p3 = pnand %p1131_p2, %p1128_p1 }
 0x260   :  { %1136 = shalt.err (!%p1133_p3)
}
 0x261   :  { %795 = dma.vmem_to_hbm [thread:$0]  %s790_s12, 64, %s1264_s5, [#allocation4], %s1144_s28, %s1144_s28, %s1145_s29  }
 0x262   :  { %1141 = dma.done.wait [#allocation4], 128  }
 0x263   :  { %1142 = vsyncadd [#allocation4], 4294967168 }
 0x264   :  { %799 = vsyncpa [#allocation3], 1 }
 0x265   :  { %800 = vsyncpa [#allocation6], 1 }
 0x266   :  { %801 = vsyncpa [#allocation4], 1 }

</bundles_post_ra>
